<compile_context>
chip_gen: v7x
topology: tpu7x:2x2x1
jax: 0.10.0
libtpu: 0.0.40
codegen_flags: <defaults>
</compile_context>

<pallas_src>
import functools

import jax
import jax.numpy as jnp
from jax.experimental import pallas as pl
from jax.experimental.pallas import tpu as pltpu


def _round_up(x, m):
    return (x + m - 1) // m * m


def _cdiv(a, b):
    return -(-a // b)


# ----------------------------- kernels ------------------------------------


def _fused_kernel(x_ref, m_ref, w_ref, b_ref, o_ref, *, eps):
    x = x_ref[...].astype(jnp.float32)                    # (rows, Dp)
    m = m_ref[...].astype(jnp.float32)                    # (rows, 1), {0,1}
    xm = jnp.where(m > 0.5, x, 0.0)                       # select: no NaN leak
    n = jnp.sum(m, axis=0, keepdims=True)                 # (1,1)
    s1 = jnp.sum(xm, axis=0, keepdims=True)               # (1,Dp)
    s2 = jnp.sum(xm * xm, axis=0, keepdims=True)          # (1,Dp), m binary
    mean = s1 / jnp.maximum(n, 1.0)
    # TODO(synk): single-pass sum-of-squares can lose precision when
    # |mean| >> std; a shifted/Welford merge would be more robust.
    var = (s2 - n * mean * mean) / jnp.maximum(n - 1.0, 1.0)
    var = jnp.maximum(var, 0.0)
    scale = jax.lax.rsqrt(var + eps) * w_ref[...].astype(jnp.float32)
    shift = b_ref[...].astype(jnp.float32) - mean * scale
    o_ref[...] = ((x * scale + shift) * m).astype(o_ref.dtype)


def _stats_kernel(x_ref, m_ref, s1_ref, s2_ref, n_ref,
                  s1_acc, s2_acc, n_acc, *, rows, needs_guard):
    i = pl.program_id(1)

    @pl.when(i == 0)
    def _init():
        s1_acc[...] = jnp.zeros_like(s1_acc)
        s2_acc[...] = jnp.zeros_like(s2_acc)
        n_acc[...] = jnp.zeros_like(n_acc)

    x = x_ref[...].astype(jnp.float32)                    # (TR, Dp)
    m = m_ref[...].astype(jnp.float32)                    # (TR, 1)
    if needs_guard:
        tr = x_ref.shape[0]
        t = pl.program_id(0) * pl.num_programs(1) + i     # logical row-tile idx
        rid = t * tr + jax.lax.broadcasted_iota(jnp.int32, m.shape, 0)
        m = jnp.where(rid < rows, m, 0.0)                 # zero ragged/dup rows

    xm = jnp.where(m > 0.5, x, 0.0)                       # masked values
    s1_acc[...] += jnp.sum(xm, axis=0, keepdims=True)
    s2_acc[...] += jnp.sum(xm * xm, axis=0, keepdims=True)
    n_acc[...] += jnp.sum(m, axis=0, keepdims=True)       # scalar count

    @pl.when(i == pl.num_programs(1) - 1)
    def _finalize():
        s1_ref[...] = s1_acc[...]
        s2_ref[...] = s2_acc[...]
        n_ref[...] = n_acc[...]


def _apply_kernel(x_ref, m_ref, scale_ref, shift_ref, o_ref):
    x = x_ref[...].astype(jnp.float32)
    m = m_ref[...].astype(jnp.float32)
    y = (x * scale_ref[...] + shift_ref[...]) * m
    o_ref[...] = y.astype(o_ref.dtype)


# ----------------------------- wrapper -------------------------------------


@functools.partial(jax.jit, static_argnames=("eps", "row_tile", "force_two_pass"))
def masked_batch_norm(features, mask, weight, bias, eps=1e-5, *,
                      row_tile=None, force_two_pass=False):
    """features: (T, B, D) float; mask: (T, B) bool; weight/bias: (1, 1, D)."""
    T, B, D = features.shape
    rows = T * B
    itemsize = jnp.dtype(features.dtype).itemsize

    # Lane-pad the feature axis only when D < 128 (small copy, lane-dense
    # stores).  For D >= 128 use the full array dim as the block's last dim.
    pad_d = (D < 128) and (D % 128 != 0)
    Dp = 128 if pad_d else D

    x2 = features.reshape(rows, D)
    m2 = mask.reshape(rows, 1).astype(jnp.bfloat16)       # exact for {0,1}
    w2 = weight.reshape(1, D).astype(jnp.float32)
    b2 = bias.reshape(1, D).astype(jnp.float32)
    if pad_d:
        x2 = jnp.pad(x2, ((0, 0), (0, Dp - D)))
        w2 = jnp.pad(w2, ((0, 0), (0, Dp - D)))
        b2 = jnp.pad(b2, ((0, 0), (0, Dp - D)))

    vec_bytes = Dp * 4
    x_bytes = rows * Dp * itemsize

    try:
        vmem_cap = int(pltpu.get_tpu_info().vmem_capacity_bytes)
    except Exception:
        vmem_cap = 64 * 1024 * 1024                       # conservative (v7x)

    # ---- fused VMEM-resident fast path: x read from HBM exactly once ----
    fused_budget = min(vmem_cap * 3 // 4, 96 * 1024 * 1024)
    fused_need = (2 * x_bytes + 3 * rows * Dp * 4 + rows * 256
                  + 8 * vec_bytes + (2 << 20))
    if (not force_two_pass) and fused_need <= fused_budget:
        out2 = pl.pallas_call(
            functools.partial(_fused_kernel, eps=eps),
            out_shape=jax.ShapeDtypeStruct((rows, Dp), features.dtype),
            grid_spec=pltpu.PrefetchScalarGridSpec(
                num_scalar_prefetch=0,
                grid=(1,),
                in_specs=[
                    pl.BlockSpec((rows, Dp), lambda i: (0, 0)),
                    pl.BlockSpec((rows, 1), lambda i: (0, 0)),
                    pl.BlockSpec((1, Dp), lambda i: (0, 0)),
                    pl.BlockSpec((1, Dp), lambda i: (0, 0)),
                ],
                out_specs=pl.BlockSpec((rows, Dp), lambda i: (0, 0)),
            ),
            compiler_params=pltpu.CompilerParams(
                dimension_semantics=("arbitrary",),
                vmem_limit_bytes=int(fused_budget),
            ),
            cost_estimate=pl.CostEstimate(
                flops=8 * rows * Dp, transcendentals=Dp,
                bytes_accessed=2 * x_bytes + rows * 2 + 4 * vec_bytes),
        )(x2, m2, w2, b2)
        return out2[:, :D].reshape(T, B, D)

    # ---- two-pass row-tiled path ----
    if row_tile is not None:
        TR = max(8, _round_up(int(row_tile), 8))
    else:
        tr_cap = max(8, (4 * 1024 * 1024) // (Dp * itemsize) // 8 * 8)
        TR = min(_round_up(rows, 8), tr_cap, 8192)
    n_tiles = _cdiv(rows, TR)
    NC = 2 if n_tiles >= 2 else 1          # split stats across TCs on megacore
    n_inner = _cdiv(n_tiles, NC)
    needs_guard = (NC * n_inner * TR != rows)
    last_tile = n_tiles - 1

    tile_bytes = TR * Dp * itemsize
    tile_f32 = TR * Dp * 4
    mask_tile_bytes = TR * 128 * 2
    vmem_limit = int(min(
        48 * 1024 * 1024,
        max(32 * 1024 * 1024,
            4 * tile_bytes + 2 * tile_f32 + 4 * mask_tile_bytes
            + 32 * vec_bytes + (8 << 20))))

    def row_tile_map(c, i):
        return (jnp.minimum(c * n_inner + i, last_tile), 0)

    # pass 1: per-core partial sums
    part_s1, part_s2, part_n = pl.pallas_call(
        functools.partial(_stats_kernel, rows=rows, needs_guard=needs_guard),
        out_shape=(
            jax.ShapeDtypeStruct((NC, 1, Dp), jnp.float32),
            jax.ShapeDtypeStruct((NC, 1, Dp), jnp.float32),
            jax.ShapeDtypeStruct((NC, 1, 1), jnp.float32),
        ),
        grid_spec=pltpu.PrefetchScalarGridSpec(
            num_scalar_prefetch=0,
            grid=(NC, n_inner),
            in_specs=[
                pl.BlockSpec((TR, Dp), row_tile_map),
                pl.BlockSpec((TR, 1), row_tile_map),
            ],
            out_specs=(
                pl.BlockSpec((None, 1, Dp), lambda c, i: (c, 0, 0)),
                pl.BlockSpec((None, 1, Dp), lambda c, i: (c, 0, 0)),
                pl.BlockSpec((None, 1, 1), lambda c, i: (c, 0, 0)),
            ),
            scratch_shapes=[
                pltpu.VMEM((1, Dp), jnp.float32),   # sum(x*m)
                pltpu.VMEM((1, Dp), jnp.float32),   # sum(x*x*m)
                pltpu.VMEM((1, 1), jnp.float32),    # count
            ],
        ),
        compiler_params=pltpu.CompilerParams(
            dimension_semantics=("parallel", "arbitrary"),
            vmem_limit_bytes=vmem_limit,
        ),
        cost_estimate=pl.CostEstimate(
            flops=4 * rows * Dp, transcendentals=0,
            bytes_accessed=x_bytes + rows * 2 + 6 * vec_bytes),
    )(x2, m2)

    # tiny per-feature epilogue (pure JAX): combine partials -> scale / shift
    n = jnp.sum(part_n, axis=0)                           # (1,1)
    s1 = jnp.sum(part_s1, axis=0)                         # (1,Dp)
    s2 = jnp.sum(part_s2, axis=0)
    mean = s1 / jnp.maximum(n, 1.0)
    # TODO(synk): shifted / Welford-merge accumulation would be more robust
    # when |mean| >> std.
    var = (s2 - n * mean * mean) / jnp.maximum(n - 1.0, 1.0)
    var = jnp.maximum(var, 0.0)
    scale = jax.lax.rsqrt(var + eps) * w2
    shift = b2 - mean * scale

    # pass 2: out = (x * scale + shift) * mask
    out2 = pl.pallas_call(
        _apply_kernel,
        out_shape=jax.ShapeDtypeStruct((rows, Dp), features.dtype),
        grid_spec=pltpu.PrefetchScalarGridSpec(
            num_scalar_prefetch=0,
            grid=(n_tiles,),
            in_specs=[
                pl.BlockSpec((TR, Dp), lambda i: (i, 0)),
                pl.BlockSpec((TR, 1), lambda i: (i, 0)),
                pl.BlockSpec((1, Dp), lambda i: (0, 0)),
                pl.BlockSpec((1, Dp), lambda i: (0, 0)),
            ],
            out_specs=pl.BlockSpec((TR, Dp), lambda i: (i, 0)),
        ),
        compiler_params=pltpu.CompilerParams(
            dimension_semantics=("parallel",),
            vmem_limit_bytes=vmem_limit,
        ),
        cost_estimate=pl.CostEstimate(
            flops=3 * rows * Dp, transcendentals=0,
            bytes_accessed=2 * x_bytes + rows * 2 + 4 * vec_bytes),
    )(x2, m2, scale, shift)

    return out2[:, :D].reshape(T, B, D)


# ----------------------------- reference / demo ----------------------------


def _reference(features, mask, weight, bias, eps=1e-5):
    # Pure-JAX reference mirroring the PyTorch forward (training mode).
    masked = features[mask]                               # (N_valid, D)
    mean = masked.mean(0).reshape(1, 1, -1)
    var = masked.var(0, ddof=1).reshape(1, 1, -1)
    y = (features - mean) / jnp.sqrt(var + eps)
    y = y * weight + bias
    return y * mask[..., None].astype(features.dtype)


if __name__ == "__main__":
    key = jax.random.PRNGKey(0)

    # ---- Test 1: fused VMEM-resident path (spec-sized small shapes) ----
    T, B, D = 8, 2, 32
    k1, k2, key = jax.random.split(key, 3)
    features = jax.random.normal(k1, (T, B, D), dtype=jnp.float32)
    mask = jax.random.bernoulli(k2, p=0.7, shape=(T, B))
    mask = mask.at[0, 0].set(True).at[1, 1].set(True)     # >=2 valid rows
    weight = jnp.ones((1, 1, D), dtype=jnp.float32)       # reset_parameters()
    bias = jnp.zeros((1, 1, D), dtype=jnp.float32)

    out = jax.block_until_ready(
        masked_batch_norm(features, mask, weight, bias, eps=1e-5))
    ref = _reference(features, mask, weight, bias, eps=1e-5)
    assert out.shape == (T, B, D)
    assert jnp.allclose(out, ref, atol=1e-4, rtol=1e-4), "fused path mismatch"

    # ---- Test 2: two-pass tiled path (ragged row tiles, D % 128 != 0,
    # 2-way split stats reduction, random affine params) ----
    T2, B2, D2 = 61, 4, 160
    k1, k2, k3, k4, key = jax.random.split(key, 5)
    features2 = jax.random.normal(k1, (T2, B2, D2), dtype=jnp.float32) * 2.0 + 0.5
    mask2 = jax.random.bernoulli(k2, p=0.6, shape=(T2, B2))
    mask2 = mask2.at[0, 0].set(True).at[1, 1].set(True)
    weight2 = jax.random.normal(k3, (1, 1, D2), dtype=jnp.float32)
    bias2 = jax.random.normal(k4, (1, 1, D2), dtype=jnp.float32)

    out2 = jax.block_until_ready(
        masked_batch_norm(features2, mask2, weight2, bias2, eps=1e-5,
                          row_tile=64, force_two_pass=True))
    ref2 = _reference(features2, mask2, weight2, bias2, eps=1e-5)
    assert out2.shape == (T2, B2, D2)
    assert jnp.allclose(out2, ref2, atol=1e-3, rtol=1e-3), "two-pass mismatch"

    print("KERNEL_OK")
</pallas_src>

<mosaic_0001>
module attributes {stable_mosaic.version = 11 : i64} {
  func.func @_fused_kernel(%arg0: i32, %arg1: memref<16x128xf32, #tpu.memory_space<vmem>>, %arg2: memref<16x1xbf16, #tpu.memory_space<vmem>>, %arg3: memref<1x128xf32, #tpu.memory_space<vmem>>, %arg4: memref<1x128xf32, #tpu.memory_space<vmem>>, %arg5: memref<16x128xf32, #tpu.memory_space<vmem>>) attributes {dimension_semantics = [#tpu.dimension_semantics<arbitrary>], iteration_bounds = array<i64: 1>, scalar_prefetch = 0 : i64, scratch_operands = 0 : i64, tpu.core_type = #tpu.core_type<tc>, window_params = [{pipeline_mode = #tpu.pipeline_mode<synchronous>, transform_indices = @transform_0, window_bounds = array<i64: 16, 128>}, {pipeline_mode = #tpu.pipeline_mode<synchronous>, transform_indices = @transform_1, window_bounds = array<i64: 16, 1>}, {pipeline_mode = #tpu.pipeline_mode<synchronous>, transform_indices = @transform_2, window_bounds = array<i64: 1, 128>}, {pipeline_mode = #tpu.pipeline_mode<synchronous>, transform_indices = @transform_3, window_bounds = array<i64: 1, 128>}, {pipeline_mode = #tpu.pipeline_mode<synchronous>, transform_indices = @transform_4, window_bounds = array<i64: 16, 128>}]} {
    %c0 = arith.constant 0 : index
    %c0_0 = arith.constant 0 : index
    %0 = vector.load %arg1[%c0, %c0_0] : memref<16x128xf32, #tpu.memory_space<vmem>>, vector<16x128xf32>
    %c0_1 = arith.constant 0 : index
    %c0_2 = arith.constant 0 : index
    %1 = vector.load %arg2[%c0_1, %c0_2] : memref<16x1xbf16, #tpu.memory_space<vmem>>, vector<16x1xbf16>
    %2 = arith.extf %1 : vector<16x1xbf16> to vector<16x1xf32>
    %cst = arith.constant 5.000000e-01 : f32
    %3 = vector.broadcast %cst : f32 to vector<16x1xf32>
    %4 = arith.cmpf ogt, %2, %3 : vector<16x1xf32>
    %cst_3 = arith.constant 0.000000e+00 : f32
    %5 = vector.shape_cast %4 : vector<16x1xi1> to vector<16x1xi1>
    %6 = vector.broadcast %5 : vector<16x1xi1> to vector<16x128xi1>
    %7 = vector.broadcast %cst_3 : f32 to vector<16x128xf32>
    %8 = arith.select %6, %0, %7 : vector<16x128xi1>, vector<16x128xf32>
    %cst_4 = arith.constant dense<0.000000e+00> : vector<1xf32>
    %9 = vector.multi_reduction <add>, %2, %cst_4 [0] : vector<16x1xf32> to vector<1xf32>
    %10 = vector.shape_cast %9 : vector<1xf32> to vector<1x1xf32>
    %cst_5 = arith.constant dense<0.000000e+00> : vector<128xf32>
    %11 = vector.multi_reduction <add>, %8, %cst_5 [0] : vector<16x128xf32> to vector<128xf32>
    %12 = vector.shape_cast %11 : vector<128xf32> to vector<1x128xf32>
    %13 = arith.mulf %8, %8 : vector<16x128xf32>
    %cst_6 = arith.constant dense<0.000000e+00> : vector<128xf32>
    %14 = vector.multi_reduction <add>, %13, %cst_6 [0] : vector<16x128xf32> to vector<128xf32>
    %15 = vector.shape_cast %14 : vector<128xf32> to vector<1x128xf32>
    %cst_7 = arith.constant 1.000000e+00 : f32
    %16 = vector.broadcast %cst_7 : f32 to vector<1x1xf32>
    %17 = arith.maximumf %10, %16 : vector<1x1xf32>
    %18 = vector.broadcast %17 : vector<1x1xf32> to vector<1x128xf32>
    %19 = arith.divf %12, %18 : vector<1x128xf32>
    %20 = vector.broadcast %10 : vector<1x1xf32> to vector<1x128xf32>
    %21 = arith.mulf %20, %19 : vector<1x128xf32>
    %22 = arith.mulf %21, %19 : vector<1x128xf32>
    %23 = arith.subf %15, %22 : vector<1x128xf32>
    %cst_8 = arith.constant 1.000000e+00 : f32
    %24 = vector.broadcast %cst_8 : f32 to vector<1x1xf32>
    %25 = arith.subf %10, %24 : vector<1x1xf32>
    %cst_9 = arith.constant 1.000000e+00 : f32
    %26 = vector.broadcast %cst_9 : f32 to vector<1x1xf32>
    %27 = arith.maximumf %25, %26 : vector<1x1xf32>
    %28 = vector.broadcast %27 : vector<1x1xf32> to vector<1x128xf32>
    %29 = arith.divf %23, %28 : vector<1x128xf32>
    %cst_10 = arith.constant 0.000000e+00 : f32
    %30 = vector.broadcast %cst_10 : f32 to vector<1x128xf32>
    %31 = arith.maximumf %29, %30 : vector<1x128xf32>
    %cst_11 = arith.constant 9.99999974E-6 : f32
    %32 = vector.broadcast %cst_11 : f32 to vector<1x128xf32>
    %33 = arith.addf %31, %32 : vector<1x128xf32>
    %34 = math.rsqrt %33 : vector<1x128xf32>
    %c0_12 = arith.constant 0 : index
    %c0_13 = arith.constant 0 : index
    %35 = vector.load %arg3[%c0_12, %c0_13] : memref<1x128xf32, #tpu.memory_space<vmem>>, vector<1x128xf32>
    %36 = arith.mulf %34, %35 : vector<1x128xf32>
    %c0_14 = arith.constant 0 : index
    %c0_15 = arith.constant 0 : index
    %37 = vector.load %arg4[%c0_14, %c0_15] : memref<1x128xf32, #tpu.memory_space<vmem>>, vector<1x128xf32>
    %38 = arith.mulf %19, %36 : vector<1x128xf32>
    %39 = arith.subf %37, %38 : vector<1x128xf32>
    %40 = vector.broadcast %36 : vector<1x128xf32> to vector<16x128xf32>
    %41 = arith.mulf %0, %40 : vector<16x128xf32>
    %42 = vector.broadcast %39 : vector<1x128xf32> to vector<16x128xf32>
    %43 = arith.addf %41, %42 : vector<16x128xf32>
    %44 = vector.broadcast %2 : vector<16x1xf32> to vector<16x128xf32>
    %45 = arith.mulf %43, %44 : vector<16x128xf32>
    %c0_16 = arith.constant 0 : index
    %c0_17 = arith.constant 0 : index
    %46 = vector.load %arg5[%c0_16, %c0_17] : memref<16x128xf32, #tpu.memory_space<vmem>>, vector<16x128xf32>
    tpu.vector_store %arg5[%c0_16, %c0_17], %45 {strides = array<i32>} : memref<16x128xf32, #tpu.memory_space<vmem>>, vector<16x128xf32>,
    return
  }
  func.func @transform_0(%arg0: i32) -> (i32, i32) {
    %c0_i32 = arith.constant 0 : i32
    %c0_i32_0 = arith.constant 0 : i32
    %c0_i32_1 = arith.constant 0 : i32
    return %c0_i32, %c0_i32_0 : i32, i32
  }
  func.func @transform_1(%arg0: i32) -> (i32, i32) {
    %c0_i32 = arith.constant 0 : i32
    %c0_i32_0 = arith.constant 0 : i32
    %c0_i32_1 = arith.constant 0 : i32
    return %c0_i32, %c0_i32_0 : i32, i32
  }
  func.func @transform_2(%arg0: i32) -> (i32, i32) {
    %c0_i32 = arith.constant 0 : i32
    %c0_i32_0 = arith.constant 0 : i32
    %c0_i32_1 = arith.constant 0 : i32
    return %c0_i32, %c0_i32_0 : i32, i32
  }
  func.func @transform_3(%arg0: i32) -> (i32, i32) {
    %c0_i32 = arith.constant 0 : i32
    %c0_i32_0 = arith.constant 0 : i32
    %c0_i32_1 = arith.constant 0 : i32
    return %c0_i32, %c0_i32_0 : i32, i32
  }
  func.func @transform_4(%arg0: i32) -> (i32, i32) {
    %c0_i32 = arith.constant 0 : i32
    %c0_i32_0 = arith.constant 0 : i32
    %c0_i32_1 = arith.constant 0 : i32
    return %c0_i32, %c0_i32_0 : i32, i32
  }
}

</mosaic_0001>

<bundles_post_ra>
// kernel: masked_batch_norm.1
= control target key start
LH: loop header
LB: loop body
LE: loop exit
PB: predicated region body
PF: predicated region fallthrough
CT: control target
= control target key end

     0   :  { %vm38_vm0 = vcmask 7168   ;;  %s243_s0 = inlined_call_operand.vmem [shape: f32[16,128], index: 0, kind: input, shape index: {}]   ;;  %s244_s1 = inlined_call_operand.vmem [shape: bf16[16,1], index: 1, kind: input, shape index: {}]   ;;  %s245_s2 = inlined_call_operand.vmem [shape: f32[1,128], index: 2, kind: input, shape index: {}]   ;;  %s246_s3 = inlined_call_operand.vmem [shape: f32[1,128], index: 3, kind: input, shape index: {}]   ;;  %s247_s4 = inlined_call_operand.hbm [shape: f32[16,128], index: 4, kind: output, shape index: {}]  }
   0x1   :  { %v143_v0 = vld [vmem:[%s244_s1] sm:$0xff]  }
   0x2   :  { %9 = vsyncpa [#allocation3], 0  ;;  %v187_v1 = vmov 0   ;;  %v144_v2 = vunpack.c.l.bf16 %v143_v0  ;;  %v145_v3 = vunpack.c.h.bf16 %v143_v0  ;;  %v18_v19 = vld [vmem:[%s243_s0] sm:$0xff]  ;;  %v19_v22 = vld [vmem:[%s243_s0 + $0x8] sm:$0xff]  ;;  %v97_v53 = vlaneseq  ;;  %s188_s23 = smov [#allocation2]  }
   0x3   :  { %150 = vset.pattern.permute.xlu0 %v187_v1  ;;  %151 = vset.pattern.permute.xlu1 %v187_v1  ;;  %v92_v55 = vld [vmem:[%s245_s2] sm:$0x1]  ;;  %s130_s24 = sshll.u32 %s188_s23, 4  ;;  %s131_s24 = int_to_ptr.vmem [resolvable:$true] %s130_s24 }
   0x4   :  { %vm24_vm1 = vcmp.gt.f32.partialorder %v144_v2, 0.5  ;;  %v39_v4 = vsel %vm38_vm0, %v144_v2, 0.0  ;;  %vm25_vm2 = vcmp.gt.f32.partialorder %v145_v3, 0.5  ;;  %v40_v5 = vsel %vm38_vm0, %v145_v3, 0.0  ;;  %v94_v59 = vld [vmem:[%s246_s3] sm:$0x1]  ;;  %p168_p1 = scmp.lt.s32.totalorder %s131_s24, %s131_s24 }
   0x5   :  { %v26_v6 = vsel %vm24_vm1, 1, %v187_v1  ;;  %v41_v7 = vadd.f32 %v40_v5, %v39_v4  ;;  %v27_v8 = vsel %vm25_vm2, 1, %v187_v1  ;;  %v152_v18 = vpack.i.bf16 %v145_v3, %v144_v2  ;;  %s163_s2 = scalar_lea.vmem %s131_s24, 256 }
   0x6   :  { %29 = vperm.xlu0 %150, %v26_v6   ;;  %v98_v54 = vshrl.u32 %v97_v53, 7  ;;  %p164_p0 = scmp.ne.s32.totalorder %s131_s24, %s163_s2  ;;  %p169_p2 = scmp.lt.s32.totalorder %s163_s2, %s163_s2 }
   0x7   :  { %v42_v9 = vrot.slane %v41_v7, 4 }
   0x8   :  { %v99_v56 = vsub.s32 0, %v98_v54  ;;  %p170_p3 = por %p169_p2, %p168_p1 }
   0x9   :  { %v43_v10 = vadd.f32 %v42_v9, %v41_v7 }
   0xa   :  { %32 = vperm.xlu0 %150, %v27_v8   ;;  %p171_p4 = pnand %p170_p3, %p164_p0 }
   0xb   :  { %v44_v11 = vrot.slane %v43_v10, 2 }
   0xd   :  { %v45_v12 = vadd.f32 %v44_v11, %v43_v10 }
   0xf   :  { %v46_v13 = vrot.slane %v45_v12, 1 }
  0x11   :  { %v47_v14 = vadd.f32 %v46_v13, %v45_v12 }
  0x13   :  { %74 = vperm.xlu0 %150, %v47_v14   ;;  %v64_v15 = vmax.f32 %v47_v14, 1.0  ;;  %v141_v16 = vadd.f32 -1.0, %v47_v14 }
  0x15   :  { %67 = vperm.xlu1 %151, %v64_v15   ;;  %v81_v17 = vmax.f32 %v141_v16, 1.0 }
  0x19   :  { %84 = vperm.xlu1 %151, %v81_v17  }
  0x1d   :  { %153 = vperm.xlu1 %151, %v152_v18  }
  0x85   :  { %v30_v20 = vpop.permute.xlu0 %29 }
  0x86   :  { %vm34_vm3 = vcmp.eq.s32.totalorder %v30_v20, 1 }
  0x87   :  { %v36_v21 = vsel %vm34_vm3, %v18_v19, 0.0 }
  0x88   :  { %v55_v24 = vmul.f32 %v36_v21, %v36_v21 }
  0x89   :  { %v33_v23 = vpop.permute.xlu0 %32 }
  0x8a   :  { %vm35_vm4 = vcmp.eq.s32.totalorder %v33_v23, 1 }
  0x8b   :  { %v37_v25 = vsel %vm35_vm4, %v19_v22, 0.0 }
  0x8c   :  { %v48_v26 = vadd.f32 %v37_v25, %v36_v21  ;;  %v56_v27 = vmul.f32 %v37_v25, %v37_v25 }
  0x8e   :  { %v49_v28 = vrot.slane %v48_v26, 4  ;;  %v57_v29 = vadd.f32 %v56_v27, %v55_v24 }
  0x90   :  { %v50_v30 = vadd.f32 %v49_v28, %v48_v26  ;;  %v58_v31 = vrot.slane %v57_v29, 4 }
  0x92   :  { %v51_v32 = vrot.slane %v50_v30, 2  ;;  %v59_v33 = vadd.f32 %v58_v31, %v57_v29  ;;  %v75_v44 = vpop.permute.xlu0 %74 }
  0x94   :  { %v68_v34 = vpop.permute.xlu1 %67  ;;  %v52_v35 = vadd.f32 %v51_v32, %v50_v30  ;;  %v60_v36 = vrot.slane %v59_v33, 2 }
  0x95   :  { %157 = vrcp.f32 %v68_v34 }
  0x96   :  { %v53_v37 = vrot.slane %v52_v35, 1  ;;  %v61_v39 = vadd.f32 %v60_v36, %v59_v33 }
  0x98   :  { %v85_v38 = vpop.permute.xlu1 %84  ;;  %v54_v40 = vadd.f32 %v53_v37, %v52_v35  ;;  %v62_v42 = vrot.slane %v61_v39, 1 }
  0x99   :  { %159 = vrcp.f32 %v85_v38 }
  0x9a   :  { %v63_v46 = vadd.f32 %v62_v42, %v61_v39 }
  0x9c   :  { %v154_v63 = vpop.permute.xlu1 %153 }
  0x9d   :  { %v156_v3 = vunpack.i.h.bf16 %v154_v63  ;;  %v155_v4 = vunpack.i.l.bf16 %v154_v63 }
  0x9f   :  { %v158_v41 = vpop.eup %157 }
  0xa0   :  { %v71_v43 = vmul.f32 %v158_v41, %v54_v40 }
  0xa2   :  { %v77_v45 = vmul.f32 %v75_v44, %v71_v43 }
  0xa3   :  { %v160_v49 = vpop.eup %159 }
  0xa4   :  { %v78_v47 = vmul.f32 %v77_v45, %v71_v43 }
  0xa6   :  { %v79_v48 = vsub.f32 %v63_v46, %v78_v47 }
  0xa8   :  { %v88_v50 = vmul.f32 %v160_v49, %v79_v48 }
  0xaa   :  { %v89_v51 = vmax.f32 %v88_v50, 0.0 }
  0xac   :  { %v90_v52 = vadd.f32 1e-05, %v89_v51 }
  0xae   :  { %161 = vrsqrt.f32 %v90_v52 }
  0xb8   :  { %v162_v57 = vpop.eup %161 }
  0xb9   :  { %v93_v58 = vmul.f32 %v162_v57, %v92_v55 }
  0xbb   :  { %v95_v60 = vmul.f32 %v93_v58, %v71_v43  ;;  %v100_v61 = vrot.slane %v93_v58, %v99_v56 }
  0xbd   :  { %v96_v62 = vsub.f32 %v94_v59, %v95_v60  ;;  %v101_v0 = vmul.f32 %v100_v61, %v18_v19  ;;  %v102_v1 = vmul.f32 %v100_v61, %v19_v22 }
  0xbf   :  { %v107_v2 = vrot.slane %v96_v62, %v99_v56 }
  0xc1   :  { %v109_v5 = vadd.f32 %v107_v2, %v101_v0  ;;  %v110_v6 = vadd.f32 %v107_v2, %v102_v1 }
  0xc3   :  { %v121_v7 = vmul.f32 %v155_v4, %v109_v5  ;;  %v122_v8 = vmul.f32 %v156_v3, %v110_v6 }
  0xc5   :  { %123 = vst [vmem:[#allocation2] sm:$0xff] %v121_v7  ;;  %124 = vst [vmem:[#allocation2 + $0x8] sm:$0xff] %v122_v8 }
  0xc6   :  { %174 = shalt.err (!%p171_p4)
}
  0xc7   :  { %s175_s26 = scalar_lea.hbm %s247_s4, 256 }
  0xc8   :  { %p176_p5 = scmp.ne.s32.totalorder %s247_s4, %s175_s26  ;;  %p179_p6 = scmp.lt.u32.totalorder %s175_s26, %s247_s4 }
  0xca   :  { %p181_p7 = pnand %p179_p6, %p176_p5 }
  0xcc   :  { %184 = shalt.err (!%p181_p7)
}
  0xcd   :  { %s189_s5 = smov 128   ;;  %s190_s6 = smov 8  }
  0xce   :  { %136 = dma.vmem_to_hbm [thread:$0]  %s131_s24, 256, %s247_s4, [#allocation3], %s189_s5, %s189_s5, %s190_s6  }
  0xcf   :  { %185 = dma.done.wait [#allocation3], 256  }
  0xd0   :  { %186 = vsyncadd [#allocation3], 4294967040 }
  0xd1   :  { %140 = vsyncpa [#allocation3], 1 }

</bundles_post_ra>
